<compile_context>
chip_gen: v6e
topology: v6e:2x2x1
jax: 0.10.0
libtpu: 0.0.40
codegen_flags: <defaults>
</compile_context>

<pallas_src>
import functools

import numpy as np
import jax
import jax.numpy as jnp
from jax import lax
from jax.experimental import pallas as pl
from jax.experimental.pallas import tpu as pltpu

EPS = 1e-5  # torch.nn.LayerNorm default eps


def _layernorm(v, gamma, beta):
    mean = jnp.mean(v, axis=-1, keepdims=True)
    var = jnp.mean((v - mean) ** 2, axis=-1, keepdims=True)
    return (v - mean) * lax.rsqrt(var + EPS) * gamma + beta


def _pick_tile(n, candidates):
    for c in candidates:
        if n >= c and n % c == 0:
            return c
    return n


def _vmem_limit_bytes():
    cap = 128 * 1024 * 1024
    try:
        info_cap = int(pltpu.get_tpu_info().vmem_capacity_bytes)
        if info_cap > 0:
            cap = info_cap
    except Exception:
        pass
    # ~75% of physical: ~48 MiB on v7x (64 MiB VMEM), ~96 MiB on v5e/v6e (128 MiB)
    return int(min(cap * 3 // 4, 100 * 1024 * 1024))


# -------- pass 1: norm1 + fused Q/K/V projections over flattened tokens -------
def proj_kernel(x_ref, e_ref, wq_ref, wk_ref, wv_ref, ln1_ref,
                xn_ref, fq_ref, fk_ref, fv_ref):
    x = x_ref[...]                                    # (TM, E) f32
    e = e_ref[...]                                    # (TM, E) f32

    xn = _layernorm(x, ln1_ref[0], ln1_ref[1])        # norm1 (f32)
    xn_ref[...] = xn

    # bf16 operands, f32 MXU accumulation; outputs stored lane-dense (H*A minor)
    xb = xn.astype(jnp.bfloat16)
    eb = e.astype(jnp.bfloat16)
    fq_ref[...] = jnp.dot(xb, wq_ref[...],
                          preferred_element_type=jnp.float32).astype(jnp.bfloat16)
    fk_ref[...] = jnp.dot(eb, wk_ref[...],
                          preferred_element_type=jnp.float32).astype(jnp.bfloat16)
    fv_ref[...] = jnp.dot(eb, wv_ref[...],
                          preferred_element_type=jnp.float32).astype(jnp.bfloat16)


# ---------------- pass 2: per-batch pre-mask score minimum only ----------------
def score_min_kernel(fq_ref, fk_ref, min_ref, *, n_heads, attn_size):
    H, A = n_heads, attn_size
    Sq, Sk = fq_ref.shape[1], fk_ref.shape[1]

    # head split via f32 reshape+transpose (known-good lowering), bf16 at the dot
    fqh = jnp.transpose(fq_ref[0].astype(jnp.float32).reshape(Sq, H, A), (1, 0, 2))
    fkh = jnp.transpose(fk_ref[0].astype(jnp.float32).reshape(Sk, H, A), (1, 0, 2))
    scores = lax.dot_general(
        fqh.astype(jnp.bfloat16), fkh.astype(jnp.bfloat16),
        dimension_numbers=(((2,), (2,)), ((0,), (0,))),
        preferred_element_type=jnp.float32)            # (H, Sq, Sk) f32, never stored
    inv_div = 1.0 / float(np.sqrt(A))
    min_ref[...] = (jnp.min(scores) * inv_div).reshape(1, 1, 1)


# ---- pass 3: recompute scores, mask, clamp, softmax, attend, out-proj, FFN ----
def attn_ffn_kernel(min_ref, qmask_ref, kmask_ref, fq_ref, fk_ref, fv_ref, xn_ref,
                    wo_ref, w1_ref, w2_ref, vec_ref, out_ref,
                    *, n_heads, attn_size):
    H, A = n_heads, attn_size
    HA = H * A
    TQ, Sk = fq_ref.shape[1], fk_ref.shape[1]

    new_min = min_ref[0, 0]                            # global pre-mask min (SMEM scalar)

    fqh = jnp.transpose(fq_ref[0].astype(jnp.float32).reshape(TQ, H, A), (1, 0, 2))
    fkh = jnp.transpose(fk_ref[0].astype(jnp.float32).reshape(Sk, H, A), (1, 0, 2))
    fvh = jnp.transpose(fv_ref[0].astype(jnp.float32).reshape(Sk, H, A), (1, 0, 2))

    inv_div = 1.0 / float(np.sqrt(A))
    f = lax.dot_general(
        fqh.astype(jnp.bfloat16), fkh.astype(jnp.bfloat16),
        dimension_numbers=(((2,), (2,)), ((0,), (0,))),
        preferred_element_type=jnp.float32) * inv_div  # (H, TQ, Sk) f32

    qm = qmask_ref[0]                                  # (1, TQ)
    km = kmask_ref[0]                                  # (1, Sk)
    f = f + qm[:, :, None] + km[:, None, :]
    # torch: clamp(f, new_min, f.max()) -- the upper bound is elementwise a no-op
    f = jnp.maximum(f, new_min)

    # softmax over keys (f32); divide goes to the otherwise-idle EUP slot
    f = f - jnp.max(f, axis=-1, keepdims=True)
    p = jnp.exp(f)
    p = p * pl.reciprocal(jnp.sum(p, axis=-1, keepdims=True), approx=True)

    # attend for all heads at once
    attn = lax.dot_general(
        p.astype(jnp.bfloat16), fvh.astype(jnp.bfloat16),
        dimension_numbers=(((2,), (1,)), ((0,), (0,))),
        preferred_element_type=jnp.float32)            # (H, TQ, A)
    attn = jnp.transpose(attn, (1, 0, 2)).reshape(TQ, HA)

    b_out, g2, b2, g3, b3, b_fc1, b_fc2 = (vec_ref[i] for i in range(7))

    # single output projection (K = H*A), bias added once
    out = jnp.dot(attn.astype(jnp.bfloat16), wo_ref[...],
                  preferred_element_type=jnp.float32) + b_out

    # residual + norm2
    x2 = _layernorm(out + xn_ref[0], g2, b2)

    # feed-forward: Linear -> ReLU -> Linear
    h1 = jnp.dot(x2.astype(jnp.bfloat16), w1_ref[...],
                 preferred_element_type=jnp.float32) + b_fc1
    h1 = jnp.maximum(h1, 0.0)
    h2 = jnp.dot(h1.astype(jnp.bfloat16), w2_ref[...],
                 preferred_element_type=jnp.float32) + b_fc2

    # residual + norm3
    out_ref[0] = _layernorm(h2 + x2, g3, b3)
    # TODO(synk): dropout (drop_p=0 -> identity) and the prob_embs / prob_attn
    # branches (disabled by default) are intentionally not implemented.


# --------------------------------- wrapper ------------------------------------
def attn_block(x, encs, params, x_mask=None, enc_mask=None, *, n_heads, attn_size):
    B, S, E = x.shape
    H, A = n_heads, attn_size
    HA = H * A
    BS = B * S
    f32, bf16 = jnp.float32, jnp.bfloat16

    if x_mask is None:
        x_mask = jnp.zeros((B, S), f32)
    if enc_mask is None:
        enc_mask = jnp.zeros((B, S), f32)

    xf = x.astype(f32).reshape(BS, E)                  # batch collapsed into M
    ef = encs.astype(f32).reshape(BS, E)
    xm3 = x_mask.astype(f32).reshape(B, 1, S)
    em3 = enc_mask.astype(f32).reshape(B, 1, S)

    # pack 1-D LayerNorm / bias params into stacked matrices (fewer DMA descriptors)
    ln1 = jnp.stack([params['g1'], params['b1']]).astype(f32)              # (2, E)
    vec = jnp.stack([params['b_out'], params['g2'], params['b2'],
                     params['g3'], params['b3'],
                     params['b_fc1'], params['b_fc2']]).astype(f32)        # (7, E)

    # cast weight matrices to bf16 once (halves weight DMA; MXU runs bf16)
    wq = params['w_q'].astype(bf16)
    wk = params['w_k'].astype(bf16)
    wv = params['w_v'].astype(bf16)
    wo = params['w_out'].astype(bf16)
    w1 = params['w_fc1'].astype(bf16)
    w2 = params['w_fc2'].astype(bf16)

    TM = _pick_tile(BS, (512, 256, 128))   # token-tile rows for the projections
    TQ = _pick_tile(S, (256, 128))         # query-tile rows for attention
    nq = S // TQ
    vmem_limit = _vmem_limit_bytes()

    # ---- pass 1: norm1 + fused Q/K/V projections (flattened tokens) ----
    cost1 = pl.CostEstimate(
        flops=int(2 * BS * E * HA * 3 + 10 * BS * E),
        transcendentals=int(BS),
        bytes_accessed=int(2 * BS * E * 4 + 3 * E * HA * 2 + 2 * E * 4
                           + BS * E * 4 + 3 * BS * HA * 2))
    xn_f, fq_f, fk_f, fv_f = pl.pallas_call(
        proj_kernel,
        out_shape=(jax.ShapeDtypeStruct((BS, E), f32),
                   jax.ShapeDtypeStruct((BS, HA), bf16),
                   jax.ShapeDtypeStruct((BS, HA), bf16),
                   jax.ShapeDtypeStruct((BS, HA), bf16)),
        grid=(BS // TM,),
        in_specs=[
            pl.BlockSpec((TM, E), lambda t: (t, 0)),      # x (flattened)
            pl.BlockSpec((TM, E), lambda t: (t, 0)),      # encs (flattened)
            pl.BlockSpec((E, HA), lambda t: (0, 0)),      # w_q
            pl.BlockSpec((E, HA), lambda t: (0, 0)),      # w_k
            pl.BlockSpec((E, HA), lambda t: (0, 0)),      # w_v
            pl.BlockSpec((2, E), lambda t: (0, 0)),       # [g1; b1]
        ],
        out_specs=(
            pl.BlockSpec((TM, E), lambda t: (t, 0)),
            pl.BlockSpec((TM, HA), lambda t: (t, 0)),
            pl.BlockSpec((TM, HA), lambda t: (t, 0)),
            pl.BlockSpec((TM, HA), lambda t: (t, 0)),
        ),
        compiler_params=pltpu.CompilerParams(
            dimension_semantics=("parallel",),
            vmem_limit_bytes=vmem_limit),
        cost_estimate=cost1,
    )(xf, ef, wq, wk, wv, ln1)

    # free (contiguous) reshapes back to per-batch views for the attention passes
    xn = xn_f.reshape(B, S, E)
    fq = fq_f.reshape(B, S, HA)
    fk = fk_f.reshape(B, S, HA)
    fv = fv_f.reshape(B, S, HA)

    # ---- pass 2: per-batch pre-mask score minimum (no S^2 HBM traffic) ----
    k_min = functools.partial(score_min_kernel, n_heads=H, attn_size=A)
    cost2 = pl.CostEstimate(
        flops=int(2 * B * H * S * S * A),
        transcendentals=0,
        bytes_accessed=int(2 * B * S * HA * 2 + B * 4))
    minb = pl.pallas_call(
        k_min,
        out_shape=jax.ShapeDtypeStruct((B, 1, 1), f32),
        grid=(B,),
        in_specs=[
            pl.BlockSpec((1, S, HA), lambda b: (b, 0, 0)),
            pl.BlockSpec((1, S, HA), lambda b: (b, 0, 0)),
        ],
        out_specs=pl.BlockSpec((1, 1, 1), lambda b: (b, 0, 0)),
        compiler_params=pltpu.CompilerParams(
            dimension_semantics=("parallel",),
            vmem_limit_bytes=vmem_limit),
        cost_estimate=cost2,
    )(fq, fk)

    # torch: new_min = f.min().item() over ALL batches/heads BEFORE the q/k masks.
    # Only B scalars cross HBM; reduce them here and hand the result to pass 3
    # through SMEM.
    new_min = jnp.min(minb).reshape(1, 1)

    # ---- pass 3: recompute scores, mask, clamp, softmax, attend, out-proj,
    #      norm2, FFN, norm3 ----
    k_attn = functools.partial(attn_ffn_kernel, n_heads=H, attn_size=A)
    cost3 = pl.CostEstimate(
        flops=int(4 * B * H * S * S * A + 2 * B * S * HA * E
                  + 4 * B * S * E * E + 40 * B * S * E),
        transcendentals=int(B * H * S * S + 4 * B * S),
        bytes_accessed=int(B * S * HA * 2 * (1 + 2 * nq) + 2 * B * S * E * 4
                           + (HA * E + 2 * E * E) * 2 + 9 * E * 4
                           + 2 * B * S * 4))
    out = pl.pallas_call(
        k_attn,
        out_shape=jax.ShapeDtypeStruct((B, S, E), f32),
        grid=(B, nq),
        in_specs=[
            pl.BlockSpec(memory_space=pltpu.MemorySpace.SMEM),    # new_min scalar
            pl.BlockSpec((1, 1, TQ), lambda b, q: (b, 0, q)),     # x_mask q-tile
            pl.BlockSpec((1, 1, S), lambda b, q: (b, 0, 0)),      # enc_mask
            pl.BlockSpec((1, TQ, HA), lambda b, q: (b, q, 0)),    # fq q-tile
            pl.BlockSpec((1, S, HA), lambda b, q: (b, 0, 0)),     # fk
            pl.BlockSpec((1, S, HA), lambda b, q: (b, 0, 0)),     # fv
            pl.BlockSpec((1, TQ, E), lambda b, q: (b, q, 0)),     # xn q-tile
            pl.BlockSpec((HA, E), lambda b, q: (0, 0)),           # w_out
            pl.BlockSpec((E, E), lambda b, q: (0, 0)),            # w_fc1
            pl.BlockSpec((E, E), lambda b, q: (0, 0)),            # w_fc2
            pl.BlockSpec((7, E), lambda b, q: (0, 0)),            # packed 1-D params
        ],
        out_specs=pl.BlockSpec((1, TQ, E), lambda b, q: (b, q, 0)),
        compiler_params=pltpu.CompilerParams(
            dimension_semantics=("parallel", "parallel"),
            vmem_limit_bytes=vmem_limit),
        cost_estimate=cost3,
    )(new_min, xm3, em3, fq, fk, fv, xn, wo, w1, w2, vec)
    return out


# ------------------------------ pure-JAX reference -----------------------------
def attn_block_ref(x, encs, x_mask, enc_mask, p, *, n_heads, attn_size):
    B, S, E = x.shape
    H, A = n_heads, attn_size

    def ln(v, g, b):
        m = v.mean(-1, keepdims=True)
        var = ((v - m) ** 2).mean(-1, keepdims=True)
        return (v - m) / jnp.sqrt(var + EPS) * g + b

    xn = ln(x, p['g1'], p['b1'])
    fq = (xn @ p['w_q']).reshape(B, S, H, A).transpose(0, 2, 1, 3)
    fk = (encs @ p['w_k']).reshape(B, S, H, A).transpose(0, 2, 3, 1)
    fv = (encs @ p['w_v']).reshape(B, S, H, A).transpose(0, 2, 1, 3)
    f = jnp.einsum('bhqa,bhak->bhqk', fq, fk) / np.sqrt(A)
    new_min = f.min()
    f = f + x_mask[:, None, :, None] + enc_mask[:, None, None, :]
    f = jnp.clip(f, new_min, f.max())
    ps = jax.nn.softmax(f, axis=-1)
    attns = jnp.einsum('bhqk,bhka->bhqa', ps, fv).transpose(0, 2, 1, 3).reshape(B, S, H * A)
    out = attns @ p['w_out'] + p['b_out']
    x2 = ln(out + xn, p['g2'], p['b2'])
    h = jax.nn.relu(x2 @ p['w_fc1'] + p['b_fc1']) @ p['w_fc2'] + p['b_fc2']
    return ln(h + x2, p['g3'], p['b3'])


def make_params(key, emb_size, attn_size, n_heads):
    E, A, H = emb_size, attn_size, n_heads
    ks = jax.random.split(key, 12)
    xavier = np.sqrt((E + A * H) / 2.0)
    p = {
        'w_q': jax.random.normal(ks[0], (E, A * H), jnp.float32) / xavier,
        'w_k': jax.random.normal(ks[1], (E, A * H), jnp.float32) / xavier,
        'w_v': jax.random.normal(ks[2], (E, A * H), jnp.float32) / xavier,
        'w_out': jax.random.normal(ks[3], (A * H, E), jnp.float32) * 0.1,
        'b_out': jax.random.normal(ks[4], (E,), jnp.float32) * 0.1,
        'w_fc1': jax.random.normal(ks[5], (E, E), jnp.float32) * 0.1,
        'b_fc1': jax.random.normal(ks[6], (E,), jnp.float32) * 0.1,
        'w_fc2': jax.random.normal(ks[7], (E, E), jnp.float32) * 0.1,
        'b_fc2': jax.random.normal(ks[8], (E,), jnp.float32) * 0.1,
        'g1': 1.0 + 0.1 * jax.random.normal(ks[9], (E,), jnp.float32),
        'b1': 0.1 * jax.random.normal(ks[10], (E,), jnp.float32),
        'g2': 1.0 + 0.1 * jax.random.normal(ks[11], (E,), jnp.float32),
        'b2': jnp.zeros((E,), jnp.float32),
        'g3': jnp.ones((E,), jnp.float32),
        'b3': jnp.zeros((E,), jnp.float32),
    }
    return p


if __name__ == "__main__":
    B, S, E = 2, 8, 32
    A, H = 4, 8  # attn_size, n_heads (A * H == E, matching the torch module defaults)

    key = jax.random.PRNGKey(0)
    k_x, k_e, k_p = jax.random.split(key, 3)
    x = jax.random.normal(k_x, (B, S, E), jnp.float32)
    encs = jax.random.normal(k_e, (B, S, E), jnp.float32)
    params = make_params(k_p, E, A, H)

    # optional additive masks (0 / -1e9), exercising the q_mask / k_mask path
    x_mask = jnp.zeros((B, S), jnp.float32)
    enc_mask = jnp.zeros((B, S), jnp.float32).at[0, -2:].set(-1e9)

    out = attn_block(x, encs, params, x_mask, enc_mask, n_heads=H, attn_size=A)
    out = jax.block_until_ready(out)

    ref = attn_block_ref(x, encs, x_mask, enc_mask, params, n_heads=H, attn_size=A)
    # tolerance covers bf16 MXU operands / bf16-stored projections (f32 accumulation)
    np.testing.assert_allclose(np.asarray(out), np.asarray(ref), rtol=5e-2, atol=5e-2)

    print("KERNEL_OK")
</pallas_src>

<mosaic_0001>
module attributes {stable_mosaic.version = 11 : i64} {
  func.func @proj_kernel(%arg0: i32, %arg1: memref<16x32xf32, #tpu.memory_space<vmem>>, %arg2: memref<16x32xf32, #tpu.memory_space<vmem>>, %arg3: memref<32x32xbf16, #tpu.memory_space<vmem>>, %arg4: memref<32x32xbf16, #tpu.memory_space<vmem>>, %arg5: memref<32x32xbf16, #tpu.memory_space<vmem>>, %arg6: memref<2x32xf32, #tpu.memory_space<vmem>>, %arg7: memref<16x32xf32, #tpu.memory_space<vmem>>, %arg8: memref<16x32xbf16, #tpu.memory_space<vmem>>, %arg9: memref<16x32xbf16, #tpu.memory_space<vmem>>, %arg10: memref<16x32xbf16, #tpu.memory_space<vmem>>) attributes {dimension_semantics = [#tpu.dimension_semantics<parallel>], iteration_bounds = array<i64: 1>, scalar_prefetch = 0 : i64, scratch_operands = 0 : i64, tpu.core_type = #tpu.core_type<tc>, window_params = [{transform_indices = @transform_0, window_bounds = array<i64: 16, 32>}, {transform_indices = @transform_1, window_bounds = array<i64: 16, 32>}, {pipeline_mode = #tpu.pipeline_mode<synchronous>, transform_indices = @transform_2, window_bounds = array<i64: 32, 32>}, {pipeline_mode = #tpu.pipeline_mode<synchronous>, transform_indices = @transform_3, window_bounds = array<i64: 32, 32>}, {pipeline_mode = #tpu.pipeline_mode<synchronous>, transform_indices = @transform_4, window_bounds = array<i64: 32, 32>}, {pipeline_mode = #tpu.pipeline_mode<synchronous>, transform_indices = @transform_5, window_bounds = array<i64: 2, 32>}, {transform_indices = @transform_6, window_bounds = array<i64: 16, 32>}, {transform_indices = @transform_7, window_bounds = array<i64: 16, 32>}, {transform_indices = @transform_8, window_bounds = array<i64: 16, 32>}, {transform_indices = @transform_9, window_bounds = array<i64: 16, 32>}]} {
    %c0 = arith.constant 0 : index
    %c0_0 = arith.constant 0 : index
    %0 = vector.load %arg1[%c0, %c0_0] : memref<16x32xf32, #tpu.memory_space<vmem>>, vector<16x32xf32>
    %c0_1 = arith.constant 0 : index
    %c0_2 = arith.constant 0 : index
    %1 = vector.load %arg2[%c0_1, %c0_2] : memref<16x32xf32, #tpu.memory_space<vmem>>, vector<16x32xf32>
    %c0_3 = arith.constant 0 : index
    %c0_4 = arith.constant 0 : index
    %2 = vector.load %arg6[%c0_3, %c0_4] : memref<2x32xf32, #tpu.memory_space<vmem>>, vector<1x32xf32>
    %3 = vector.shape_cast %2 : vector<1x32xf32> to vector<32xf32>
    %c1 = arith.constant 1 : index
    %c0_5 = arith.constant 0 : index
    %4 = vector.load %arg6[%c1, %c0_5] : memref<2x32xf32, #tpu.memory_space<vmem>>, vector<1x32xf32>
    %5 = vector.shape_cast %4 : vector<1x32xf32> to vector<32xf32>
    %cst = arith.constant dense<0.000000e+00> : vector<16xf32>
    %6 = vector.multi_reduction <add>, %0, %cst [1] : vector<16x32xf32> to vector<16xf32>
    %7 = vector.shape_cast %6 : vector<16xf32> to vector<16x1xf32>
    %cst_6 = arith.constant 3.200000e+01 : f32
    %8 = vector.broadcast %cst_6 : f32 to vector<16x1xf32>
    %9 = arith.divf %7, %8 : vector<16x1xf32>
    %10 = vector.broadcast %9 : vector<16x1xf32> to vector<16x32xf32>
    %11 = arith.subf %0, %10 : vector<16x32xf32>
    %12 = arith.mulf %11, %11 : vector<16x32xf32>
    %cst_7 = arith.constant dense<0.000000e+00> : vector<16xf32>
    %13 = vector.multi_reduction <add>, %12, %cst_7 [1] : vector<16x32xf32> to vector<16xf32>
    %14 = vector.shape_cast %13 : vector<16xf32> to vector<16x1xf32>
    %cst_8 = arith.constant 3.200000e+01 : f32
    %15 = vector.broadcast %cst_8 : f32 to vector<16x1xf32>
    %16 = arith.divf %14, %15 : vector<16x1xf32>
    %17 = vector.broadcast %9 : vector<16x1xf32> to vector<16x32xf32>
    %18 = arith.subf %0, %17 : vector<16x32xf32>
    %cst_9 = arith.constant 9.99999974E-6 : f32
    %19 = vector.broadcast %cst_9 : f32 to vector<16x1xf32>
    %20 = arith.addf %16, %19 : vector<16x1xf32>
    %21 = math.rsqrt %20 : vector<16x1xf32>
    %22 = vector.broadcast %21 : vector<16x1xf32> to vector<16x32xf32>
    %23 = arith.mulf %18, %22 : vector<16x32xf32>
    %24 = vector.shape_cast %3 : vector<32xf32> to vector<1x32xf32>
    %25 = vector.broadcast %24 : vector<1x32xf32> to vector<16x32xf32>
    %26 = arith.mulf %23, %25 : vector<16x32xf32>
    %27 = vector.shape_cast %5 : vector<32xf32> to vector<1x32xf32>
    %28 = vector.broadcast %27 : vector<1x32xf32> to vector<16x32xf32>
    %29 = arith.addf %26, %28 : vector<16x32xf32>
    %c0_10 = arith.constant 0 : index
    %c0_11 = arith.constant 0 : index
    %30 = vector.load %arg7[%c0_10, %c0_11] : memref<16x32xf32, #tpu.memory_space<vmem>>, vector<16x32xf32>
    tpu.vector_store %arg7[%c0_10, %c0_11], %29 {strides = array<i32>} : memref<16x32xf32, #tpu.memory_space<vmem>>, vector<16x32xf32>,
    %31 = arith.truncf %29 : vector<16x32xf32> to vector<16x32xbf16>
    %32 = arith.truncf %1 : vector<16x32xf32> to vector<16x32xbf16>
    %c0_12 = arith.constant 0 : index
    %c0_13 = arith.constant 0 : index
    %33 = vector.load %arg3[%c0_12, %c0_13] : memref<32x32xbf16, #tpu.memory_space<vmem>>, vector<32x32xbf16>
    %cst_14 = arith.constant dense<0.000000e+00> : vector<16x32xf32>
    %34 = tpu.matmul %31, %33, %cst_14 {dimension_numbers = #tpu.dot_dimension_numbers<[1], [0], [0], [1], [0, 0, 1, 1], [], []>} : vector<16x32xbf16>, vector<32x32xbf16>, vector<16x32xf32> -> vector<16x32xf32>
    %35 = arith.truncf %34 : vector<16x32xf32> to vector<16x32xbf16>
    %c0_15 = arith.constant 0 : index
    %c0_16 = arith.constant 0 : index
    %36 = vector.load %arg8[%c0_15, %c0_16] : memref<16x32xbf16, #tpu.memory_space<vmem>>, vector<16x32xbf16>
    tpu.vector_store %arg8[%c0_15, %c0_16], %35 {strides = array<i32>} : memref<16x32xbf16, #tpu.memory_space<vmem>>, vector<16x32xbf16>,
    %c0_17 = arith.constant 0 : index
    %c0_18 = arith.constant 0 : index
    %37 = vector.load %arg4[%c0_17, %c0_18] : memref<32x32xbf16, #tpu.memory_space<vmem>>, vector<32x32xbf16>
    %cst_19 = arith.constant dense<0.000000e+00> : vector<16x32xf32>
    %38 = tpu.matmul %32, %37, %cst_19 {dimension_numbers = #tpu.dot_dimension_numbers<[1], [0], [0], [1], [0, 0, 1, 1], [], []>} : vector<16x32xbf16>, vector<32x32xbf16>, vector<16x32xf32> -> vector<16x32xf32>
    %39 = arith.truncf %38 : vector<16x32xf32> to vector<16x32xbf16>
    %c0_20 = arith.constant 0 : index
    %c0_21 = arith.constant 0 : index
    %40 = vector.load %arg9[%c0_20, %c0_21] : memref<16x32xbf16, #tpu.memory_space<vmem>>, vector<16x32xbf16>
    tpu.vector_store %arg9[%c0_20, %c0_21], %39 {strides = array<i32>} : memref<16x32xbf16, #tpu.memory_space<vmem>>, vector<16x32xbf16>,
    %c0_22 = arith.constant 0 : index
    %c0_23 = arith.constant 0 : index
    %41 = vector.load %arg5[%c0_22, %c0_23] : memref<32x32xbf16, #tpu.memory_space<vmem>>, vector<32x32xbf16>
    %cst_24 = arith.constant dense<0.000000e+00> : vector<16x32xf32>
    %42 = tpu.matmul %32, %41, %cst_24 {dimension_numbers = #tpu.dot_dimension_numbers<[1], [0], [0], [1], [0, 0, 1, 1], [], []>} : vector<16x32xbf16>, vector<32x32xbf16>, vector<16x32xf32> -> vector<16x32xf32>
    %43 = arith.truncf %42 : vector<16x32xf32> to vector<16x32xbf16>
    %c0_25 = arith.constant 0 : index
    %c0_26 = arith.constant 0 : index
    %44 = vector.load %arg10[%c0_25, %c0_26] : memref<16x32xbf16, #tpu.memory_space<vmem>>, vector<16x32xbf16>
    tpu.vector_store %arg10[%c0_25, %c0_26], %43 {strides = array<i32>} : memref<16x32xbf16, #tpu.memory_space<vmem>>, vector<16x32xbf16>,
    return
  }
  func.func @transform_0(%arg0: i32) -> (i32, i32) {
    %c0_i32 = arith.constant 0 : i32
    %c0_i32_0 = arith.constant 0 : i32
    return %arg0, %c0_i32 : i32, i32
  }
  func.func @transform_1(%arg0: i32) -> (i32, i32) {
    %c0_i32 = arith.constant 0 : i32
    %c0_i32_0 = arith.constant 0 : i32
    return %arg0, %c0_i32 : i32, i32
  }
  func.func @transform_2(%arg0: i32) -> (i32, i32) {
    %c0_i32 = arith.constant 0 : i32
    %c0_i32_0 = arith.constant 0 : i32
    %c0_i32_1 = arith.constant 0 : i32
    return %c0_i32, %c0_i32_0 : i32, i32
  }
  func.func @transform_3(%arg0: i32) -> (i32, i32) {
    %c0_i32 = arith.constant 0 : i32
    %c0_i32_0 = arith.constant 0 : i32
    %c0_i32_1 = arith.constant 0 : i32
    return %c0_i32, %c0_i32_0 : i32, i32
  }
  func.func @transform_4(%arg0: i32) -> (i32, i32) {
    %c0_i32 = arith.constant 0 : i32
    %c0_i32_0 = arith.constant 0 : i32
    %c0_i32_1 = arith.constant 0 : i32
    return %c0_i32, %c0_i32_0 : i32, i32
  }
  func.func @transform_5(%arg0: i32) -> (i32, i32) {
    %c0_i32 = arith.constant 0 : i32
    %c0_i32_0 = arith.constant 0 : i32
    %c0_i32_1 = arith.constant 0 : i32
    return %c0_i32, %c0_i32_0 : i32, i32
  }
  func.func @transform_6(%arg0: i32) -> (i32, i32) {
    %c0_i32 = arith.constant 0 : i32
    %c0_i32_0 = arith.constant 0 : i32
    return %arg0, %c0_i32 : i32, i32
  }
  func.func @transform_7(%arg0: i32) -> (i32, i32) {
    %c0_i32 = arith.constant 0 : i32
    %c0_i32_0 = arith.constant 0 : i32
    return %arg0, %c0_i32 : i32, i32
  }
  func.func @transform_8(%arg0: i32) -> (i32, i32) {
    %c0_i32 = arith.constant 0 : i32
    %c0_i32_0 = arith.constant 0 : i32
    return %arg0, %c0_i32 : i32, i32
  }
  func.func @transform_9(%arg0: i32) -> (i32, i32) {
    %c0_i32 = arith.constant 0 : i32
    %c0_i32_0 = arith.constant 0 : i32
    return %arg0, %c0_i32 : i32, i32
  }
}

</mosaic_0001>

<bundles_post_ra>
// kernel: tpu_custom_call.1
= control target key start
LH: loop header
LB: loop body
LE: loop exit
PB: predicated region body
PF: predicated region fallthrough
CT: control target
= control target key end

     0   :  { %15 = vsyncpa [#allocation3], 0  ;;  %s839_s0 = inlined_call_operand.hbm [shape: f32[16,32], index: 0, kind: input, shape index: {}]   ;;  %s840_s1 = inlined_call_operand.hbm [shape: f32[16,32], index: 1, kind: input, shape index: {}]   ;;  %s841_s2 = inlined_call_operand.hbm [shape: bf16[32,32], index: 2, kind: input, shape index: {}]   ;;  %s842_s3 = inlined_call_operand.hbm [shape: bf16[32,32], index: 3, kind: input, shape index: {}]   ;;  %s843_s4 = inlined_call_operand.hbm [shape: bf16[32,32], index: 4, kind: input, shape index: {}]   ;;  %s844_s5 = inlined_call_operand.vmem [shape: f32[2,32], index: 5, kind: input, shape index: {}]   ;;  %s845_s6 = inlined_call_operand.hbm [shape: f32[16,32], index: 6, kind: output, shape index: {0}]   ;;  %s846_s7 = inlined_call_operand.hbm [shape: bf16[16,32], index: 7, kind: output, shape index: {1}]   ;;  %s847_s8 = inlined_call_operand.hbm [shape: bf16[16,32], index: 8, kind: output, shape index: {2}]   ;;  %s848_s9 = inlined_call_operand.hbm [shape: bf16[16,32], index: 9, kind: output, shape index: {3}]  }
   0x1   :  { %16 = vsyncpa [#allocation6], 0 }
   0x2   :  { %17 = vsyncpa [#allocation9], 0 }
   0x3   :  { %18 = vsyncpa [#allocation4], 0 }
   0x4   :  { %19 = vsyncpa [#allocation13], 0 }
   0x5   :  { %20 = vsyncpa [#allocation16], 0  ;;  %s696_s30 = smov [#allocation5]  }
   0x6   :  { %s38_s10 = sshll.u32 %s696_s30, 4  ;;  %s39_s10 = int_to_ptr.vmem [resolvable:$true] %s38_s10 }
   0x7   :  { %s512_s11 = scalar_lea.vmem %s39_s10, 256  ;;  %p517_p1 = scmp.lt.s32.totalorder %s39_s10, %s39_s10 }
   0x8   :  { %p513_p0 = scmp.ne.s32.totalorder %s39_s10, %s512_s11  ;;  %p518_p2 = scmp.lt.s32.totalorder %s512_s11, %s512_s11 }
   0xa   :  { %p519_p3 = por %p518_p2, %p517_p1 }
   0xc   :  { %p520_p4 = pnand %p519_p3, %p513_p0 }
   0xe   :  { %523 = shalt.err (!%p520_p4)
}
   0xf   :  { %s697_s12 = smov 128   ;;  %s698_s13 = smov 8  }
  0x10   :  { %44 = dma.hbm_to_vmem [thread:$0]  %s840_s1, 256, %s39_s10, [#allocation6], %s697_s12, %s697_s12, %s698_s13  }
  0x11   :  { %s699_s16 = smov [#allocation8]   ;;  %s700_s18 = smov [#allocation2]  }
  0x12   :  { %s62_s17 = sshll.u32 %s699_s16, 4  ;;  %s26_s19 = sshll.u32 %s700_s18, 4  ;;  %s63_s17 = int_to_ptr.vmem [resolvable:$true] %s62_s17  ;;  %s27_s19 = int_to_ptr.vmem [resolvable:$true] %s26_s19 }
  0x13   :  { %s532_s20 = scalar_lea.vmem %s63_s17, 256  ;;  %p537_p6 = scmp.lt.s32.totalorder %s63_s17, %s63_s17 }
  0x14   :  { %p533_p5 = scmp.ne.s32.totalorder %s63_s17, %s532_s20  ;;  %p538_p7 = scmp.lt.s32.totalorder %s532_s20, %s532_s20 }
  0x16   :  { %p539_p8 = por %p538_p7, %p537_p6 }
  0x18   :  { %p540_p9 = pnand %p539_p8, %p533_p5 }
  0x1a   :  { %543 = shalt.err (!%p540_p9)
}
  0x1b   :  { %s701_s21 = smov 64   ;;  %s702_s22 = smov 4  }
  0x1c   :  { %68 = dma.hbm_to_vmem [thread:$0]  %s842_s3, 256, %s63_s17, [#allocation9], %s701_s21, %s701_s21, %s702_s22  }
  0x1d   :  { %s552_s1 = scalar_lea.vmem %s27_s19, 256  ;;  %p557_p11 = scmp.lt.s32.totalorder %s27_s19, %s27_s19 }
  0x1e   :  { %p553_p10 = scmp.ne.s32.totalorder %s27_s19, %s552_s1  ;;  %p558_p12 = scmp.lt.s32.totalorder %s552_s1, %s552_s1 }
  0x20   :  { %p559_p13 = por %p558_p12, %p557_p11 }
  0x22   :  { %p560_p0 = pnand %p559_p13, %p553_p10 }
  0x24   :  { %563 = shalt.err (!%p560_p0)
}
  0x25   :  { %32 = dma.hbm_to_vmem [thread:$0]  %s839_s0, 256, %s27_s19, [#allocation3], %s697_s12, %s697_s12, %s698_s13  }
  0x26   :  { %s703_s27 = smov [#allocation7]   ;;  %s704_s29 = smov [#allocation10]  }
  0x27   :  { %s50_s28 = sshll.u32 %s703_s27, 4  ;;  %s74_s3 = sshll.u32 %s704_s29, 4  ;;  %s51_s28 = int_to_ptr.vmem [resolvable:$true] %s50_s28  ;;  %s75_s3 = int_to_ptr.vmem [resolvable:$true] %s74_s3 }
  0x28   :  { %s572_s30 = scalar_lea.vmem %s51_s28, 256  ;;  %p577_p2 = scmp.lt.s32.totalorder %s51_s28, %s51_s28 }
  0x29   :  { %p573_p1 = scmp.ne.s32.totalorder %s51_s28, %s572_s30  ;;  %p578_p3 = scmp.lt.s32.totalorder %s572_s30, %s572_s30 }
  0x2b   :  { %p579_p4 = por %p578_p3, %p577_p2 }
  0x2d   :  { %p580_p5 = pnand %p579_p4, %p573_p1 }
  0x2f   :  { %583 = shalt.err (!%p580_p5)
}
  0x30   :  { %56 = dma.hbm_to_vmem [thread:$0]  %s841_s2, 256, %s51_s28, [#allocation6], %s701_s21, %s701_s21, %s702_s22  }
  0x31   :  { %s592_s0 = scalar_lea.vmem %s75_s3, 256  ;;  %p597_p7 = scmp.lt.s32.totalorder %s75_s3, %s75_s3 }
  0x32   :  { %p593_p6 = scmp.ne.s32.totalorder %s75_s3, %s592_s0  ;;  %p598_p8 = scmp.lt.s32.totalorder %s592_s0, %s592_s0 }
  0x34   :  { %p599_p9 = por %p598_p8, %p597_p7 }
  0x36   :  { %p600_p10 = pnand %p599_p9, %p593_p6 }
  0x38   :  { %603 = shalt.err (!%p600_p10)
}
  0x39   :  { %80 = dma.hbm_to_vmem [thread:$0]  %s843_s4, 256, %s75_s3, [#allocation9], %s701_s21, %s701_s21, %s702_s22  }
  0x3a   :  { %684 = dma.done.wait [#allocation3], 256  }
  0x3b   :  { %685 = vsyncadd [#allocation3], 4294967040 }
  0x3c   :  { %686 = dma.done.wait [#allocation6], 512  }
  0x3d   :  { %687 = vsyncadd [#allocation6], 4294966784 }
  0x3e   :  { %688 = dma.done.wait [#allocation9], 512  }
  0x3f   :  { %689 = vsyncadd [#allocation9], 4294966784  ;;  %vm105_vm0 = vcmask 261120   ;;  %v99_v0 = vld [vmem:[#allocation2] sm:$0xff]  ;;  %v100_v1 = vld [vmem:[#allocation2 + $0x8] sm:$0xff]  ;;  %v705_v16 = vmov 0.0  }
  0x40   :  { %v106_v2 = vsel %vm105_vm0, %v99_v0, 0.0  ;;  %v109_v3 = vsel %vm105_vm0, %v100_v1, 0.0  ;;  %v494_v14 = vld [vmem:[#allocation7 + $0x8] sm:$0xff]   ;;  %v495_v15 = vld [vmem:[#allocation8 + $0x8] sm:$0xff]   ;;  %455 = vmatprep.subr.bf16.mxu0 %v705_v16  ;;  %463 = vmatprep.subr.bf16.mxu1 %v705_v16  ;;  %v496_v17 = vld [vmem:[#allocation7] sm:$0xff]   ;;  %vm706_vm1 = vmmov 0  }
  0x41   :  { %107 = vadd.xlane.f32.xlu0 %v106_v2  ;;  %456 = vmatpush3.bf16.msra.mxu0 %v494_v14  ;;  %v497_v18 = vld [vmem:[#allocation8] sm:$0xff]   ;;  %v102_v20 = vld [vmem:[#allocation5 + $0x8] sm:$0xff]  ;;  %v423_v29 = vld [vmem:[%s844_s5] ss:$0 sm:$0xff]  ;;  %vm217_vm2 = vcmask 257024  }
  0x42   :  { %464 = vmatpush3.bf16.msra.mxu1 %v495_v15  ;;  %457 = vmatprep.subr.bf16.mxu0 %v705_v16  ;;  %v101_v19 = vld [vmem:[#allocation5] sm:$0xff]  ;;  %v424_v31 = vld [vmem:[%s844_s5 + $0x1] ss:$0 sm:$0xff]  ;;  %v498_v38 = vld [vmem:[#allocation10 + $0x8] sm:$0xff]   ;;  %s707_s5 = smov [#allocation11]  }
  0x43   :  { %465 = vmatprep.subr.bf16.mxu1 %v705_v16  ;;  %459 = vmatprep.mubr.msk.bf16.mxu0 %vm706_vm1, %v705_v16  ;;  %v148_v21 = vpack.c.bf16 %v102_v20, %v101_v19  ;;  %v499_v40 = vld [vmem:[#allocation10] sm:$0xff]   ;;  %s362_s18 = sshll.u32 %s707_s5, 4  ;;  %s363_s18 = int_to_ptr.vmem [resolvable:$true] %s362_s18 }
  0x44   :  { %467 = vmatprep.mubr.msk.bf16.mxu1 %vm706_vm1, %v705_v16  ;;  %s604_s19 = scalar_lea.vmem %s363_s18, 256  ;;  %p609_p12 = scmp.lt.s32.totalorder %s363_s18, %s363_s18 }
  0x45   :  { %110 = vadd.xlane.f32.xlu0 %v109_v3  ;;  %458 = vmatpush3.bf16.msra.mxu0 %v496_v17  ;;  %p605_p11 = scmp.ne.s32.totalorder %s363_s18, %s604_s19  ;;  %p610_p13 = scmp.lt.s32.totalorder %s604_s19, %s604_s19 }
  0x46   :  { %466 = vmatpush3.bf16.msra.mxu1 %v497_v18  ;;  %471 = vmatprep.subr.bf16.mxu0 %v705_v16 }
  0x47   :  { %p611_p0 = por %p610_p13, %p609_p12 }
  0x49   :  { %468 = vmatmul.mubr.msk.bf16.vlgmr.msra.gmra.mxu1 %vm105_vm0, %v148_v21  ;;  %p612_p1 = pnand %p611_p0, %p605_p11 }
  0xca   :  { %v108_v4 = vpop.xlane.xlu0 %107 }
  0xcb   :  { %v113_v5 = vmul.f32 0.03125, %v108_v4 }
  0xcd   :  { %v115_v6 = vsub.f32 %v99_v0, %v113_v5 }
  0xce   :  { %v111_v7 = vpop.xlane.xlu0 %110 }
  0xcf   :  { %v114_v8 = vmul.f32 0.03125, %v111_v7  ;;  %v117_v9 = vmul.f32 %v115_v6, %v115_v6 }
  0xd1   :  { %v116_v10 = vsub.f32 %v100_v1, %v114_v8  ;;  %v119_v11 = vsel %vm105_vm0, %v117_v9, 0.0 }
  0xd2   :  { %120 = vadd.xlane.f32.xlu1 %v119_v11 }
  0xd3   :  { %v118_v12 = vmul.f32 %v116_v10, %v116_v10 }
  0xd5   :  { %v122_v13 = vsel %vm105_vm0, %v118_v12, 0.0 }
  0xd6   :  { %123 = vadd.xlane.f32.xlu1 %v122_v13 }
 0x109   :  { %v273_v41 = vpop.f32.mrf.mxu1 }
 0x10a   :  { %v442_v42 = vpack.c.bf16 %v273_v41, %v273_v41 }
 0x10b   :  { %v469_v43 = vpop.f32.mrf.mxu1 }
 0x10c   :  { %288 = vst.msk [vmem:[#allocation14] sm:$0xf] %vm217_vm2, %v442_v42 }
 0x10d   :  { %v276_v44 = vpop.f32.mrf.mxu1 }
 0x10e   :  { %v443_v45 = vpack.c.bf16 %v276_v44, %v276_v44 }
 0x10f   :  { %v470_v46 = vpop.f32.mrf.mxu1 }
 0x110   :  { %289 = vst.msk [vmem:[#allocation14 + $0x4] sm:$0xf] %vm217_vm2, %v443_v45 }
 0x15b   :  { %v121_v22 = vpop.xlane.xlu1 %120 }
 0x15c   :  { %v125_v23 = vmul.f32 0.03125, %v121_v22 }
 0x15e   :  { %v127_v24 = vadd.f32 1e-05, %v125_v23 }
 0x15f   :  { %v124_v25 = vpop.xlane.xlu1 %123 }
 0x160   :  { %500 = vrsqrt.f32 %v127_v24  ;;  %v126_v26 = vmul.f32 0.03125, %v124_v25 }
 0x162   :  { %v128_v27 = vadd.f32 1e-05, %v126_v26 }
 0x164   :  { %502 = vrsqrt.f32 %v128_v27 }
 0x16d   :  { %v501_v28 = vpop.eup %500 }
 0x16e   :  { %v131_v30 = vmul.f32 %v501_v28, %v115_v6 }
 0x170   :  { %v137_v32 = vmul.f32 %v423_v29, %v131_v30 }
 0x171   :  { %v503_v33 = vpop.eup %502 }
 0x172   :  { %v132_v34 = vmul.f32 %v503_v33, %v116_v10  ;;  %v143_v35 = vadd.f32 %v424_v31, %v137_v32 }
 0x174   :  { %v138_v36 = vmul.f32 %v423_v29, %v132_v34  ;;  %145 = vst.msk [vmem:[#allocation11] sm:$0xff] %vm105_vm0, %v143_v35 }
 0x176   :  { %v144_v37 = vadd.f32 %v424_v31, %v138_v36 }
 0x178   :  { %v147_v39 = vpack.c.bf16 %v144_v37, %v143_v35  ;;  %146 = vst.msk [vmem:[#allocation11 + $0x8] sm:$0xff] %vm105_vm0, %v144_v37 }
 0x17a   :  { %460 = vmatmul.mubr.msk.bf16.vlgmr.msra.gmra.mxu0 %vm105_vm0, %v147_v39 }
 0x17b   :  { %472 = vmatpush3.bf16.msra.mxu0 %v498_v38  ;;  %475 = vmatprep.mubr.msk.bf16.mxu0 %vm706_vm1, %v705_v16 }
 0x17c   :  { %473 = vmatprep.subr.bf16.mxu0 %v705_v16 }
 0x17f   :  { %474 = vmatpush3.bf16.msra.mxu0 %v499_v40 }
 0x182   :  { %476 = vmatmul.mubr.msk.bf16.vlgmr.msra.gmra.mxu0 %vm105_vm0, %v148_v21 }
 0x183   :  { %615 = shalt.err (!%p612_p1)
}
 0x184   :  { %368 = dma.vmem_to_hbm [thread:$0]  %s363_s18, 256, %s845_s6, [#allocation4], %s697_s12, %s697_s12, %s698_s13  }
 0x185   :  { %s708_s24 = smov [#allocation12]   ;;  %s709_s25 = smov [#allocation14]  }
 0x186   :  { %s374_s1 = sshll.u32 %s708_s24, 4  ;;  %s386_s26 = sshll.u32 %s709_s25, 4  ;;  %s375_s1 = int_to_ptr.vmem [resolvable:$true] %s374_s1  ;;  %s387_s26 = int_to_ptr.vmem [resolvable:$true] %s386_s26 }
 0x187   :  { %s624_s27 = scalar_lea.vmem %s375_s1, 128  ;;  %p629_p3 = scmp.lt.s32.totalorder %s375_s1, %s375_s1 }
 0x188   :  { %p625_p2 = scmp.ne.s32.totalorder %s375_s1, %s624_s27  ;;  %p630_p4 = scmp.lt.s32.totalorder %s624_s27, %s624_s27 }
 0x18a   :  { %p631_p5 = por %p630_p4, %p629_p3 }
 0x18c   :  { %p632_p6 = pnand %p631_p5, %p625_p2 }
 0x23a   :  { %v202_v47 = vpop.f32.mrf.mxu0 }
 0x23b   :  { %v440_v48 = vpack.c.bf16 %v202_v47, %v202_v47 }
 0x23c   :  { %v461_v49 = vpop.f32.mrf.mxu0 }
 0x23d   :  { %218 = vst.msk [vmem:[#allocation12] sm:$0xf] %vm217_vm2, %v440_v48 }
 0x23e   :  { %v205_v50 = vpop.f32.mrf.mxu0 }
 0x23f   :  { %v441_v51 = vpack.c.bf16 %v205_v50, %v205_v50 }
 0x240   :  { %v462_v52 = vpop.f32.mrf.mxu0 }
 0x241   :  { %219 = vst.msk [vmem:[#allocation12 + $0x4] sm:$0xf] %vm217_vm2, %v441_v51 }
 0x242   :  { %v340_v53 = vpop.f32.mrf.mxu0 }
 0x243   :  { %635 = shalt.err (!%p632_p6)
}
 0x244   :  { %380 = dma.vmem_to_hbm [thread:$0]  %s375_s1, 128, %s846_s7, [#allocation13], %s701_s21, %s701_s21, %s702_s22   ;;  %v444_v54 = vpack.c.bf16 %v340_v53, %v340_v53 }
 0x245   :  { %s644_s13 = scalar_lea.vmem %s387_s26, 128  ;;  %p649_p8 = scmp.lt.s32.totalorder %s387_s26, %s387_s26 }
 0x246   :  { %p645_p7 = scmp.ne.s32.totalorder %s387_s26, %s644_s13  ;;  %p650_p9 = scmp.lt.s32.totalorder %s644_s13, %s644_s13 }
 0x248   :  { %p651_p10 = por %p650_p9, %p649_p8 }
 0x24a   :  { %p652_p11 = pnand %p651_p10, %p645_p7 }
 0x24c   :  { %655 = shalt.err (!%p652_p11)
}
 0x24d   :  { %392 = dma.vmem_to_hbm [thread:$0]  %s387_s26, 128, %s847_s8, [#allocation13], %s701_s21, %s701_s21, %s702_s22   ;;  %v477_v55 = vpop.f32.mrf.mxu0  ;;  %355 = vst.msk [vmem:[#allocation15] sm:$0xf] %vm217_vm2, %v444_v54 }
 0x24e   :  { %s710_s3 = smov [#allocation15]  }
 0x24f   :  { %s398_s30 = sshll.u32 %s710_s3, 4  ;;  %v343_v56 = vpop.f32.mrf.mxu0  ;;  %s399_s30 = int_to_ptr.vmem [resolvable:$true] %s398_s30 }
 0x250   :  { %v445_v57 = vpack.c.bf16 %v343_v56, %v343_v56  ;;  %s664_s7 = scalar_lea.vmem %s399_s30, 128  ;;  %p669_p13 = scmp.lt.s32.totalorder %s399_s30, %s399_s30 }
 0x251   :  { %v478_v58 = vpop.f32.mrf.mxu0  ;;  %p665_p12 = scmp.ne.s32.totalorder %s399_s30, %s664_s7  ;;  %p670_p0 = scmp.lt.s32.totalorder %s664_s7, %s664_s7 }
 0x252   :  { %356 = vst.msk [vmem:[#allocation15 + $0x4] sm:$0xf] %vm217_vm2, %v445_v57 }
 0x253   :  { %p671_p1 = por %p670_p0, %p669_p13 }
 0x255   :  { %p672_p2 = pnand %p671_p1, %p665_p12 }
 0x257   :  { %675 = shalt.err (!%p672_p2)
}
 0x258   :  { %404 = dma.vmem_to_hbm [thread:$0]  %s399_s30, 128, %s848_s9, [#allocation16], %s701_s21, %s701_s21, %s702_s22  }
 0x259   :  { %690 = dma.done.wait [#allocation4], 256  }
 0x25a   :  { %691 = vsyncadd [#allocation4], 4294967040 }
 0x25b   :  { %692 = dma.done.wait [#allocation13], 256  }
 0x25c   :  { %693 = vsyncadd [#allocation13], 4294967040 }
 0x25d   :  { %694 = dma.done.wait [#allocation16], 128  }
 0x25e   :  { %695 = vsyncadd [#allocation16], 4294967168 }
 0x25f   :  { %417 = vsyncpa [#allocation3], 1 }
 0x260   :  { %418 = vsyncpa [#allocation6], 1 }
 0x261   :  { %419 = vsyncpa [#allocation9], 1 }
 0x262   :  { %420 = vsyncpa [#allocation4], 1 }
 0x263   :  { %421 = vsyncpa [#allocation13], 1 }
 0x264   :  { %422 = vsyncpa [#allocation16], 1 }

</bundles_post_ra>
